<compile_context>
chip_gen: v5e
topology: v5e:2x2
jax: 0.10.0
libtpu: 0.0.40
codegen_flags: <defaults>
</compile_context>

<pallas_src>
import functools

import jax
import jax.numpy as jnp
from jax import lax
from jax.experimental import pallas as pl
from jax.experimental.pallas import tpu as pltpu


def _round_up(x, m):
    return ((x + m - 1) // m) * m


def _round_down(x, m):
    return (x // m) * m


# ----------------------------------------------------------------------------
# in-kernel helpers
# ----------------------------------------------------------------------------
def _channel_sum(x):
    """(Bt, 3, R, W)[any dtype] -> (Bt, R, W) f32.
    conv(sum_c x_c) == sum_c conv(x_c) because the Sobel weight is identical
    for all 3 input channels -> ~3x fewer stencil taps.  The f32 cast happens
    here (after the DMA) so inputs travel HBM->VMEM in their storage dtype."""
    if x.dtype != jnp.float32:
        x = x.astype(jnp.float32)
    return x[:, 0] + x[:, 1] + x[:, 2]


def _edge_mag_interior(p):
    """Sobel edge magnitude on the valid interior via static slices.
    p: (Bt, R, W) -> (Bt, R-2, W-2).  Small / whole-image path."""
    r, w = p.shape[-2], p.shape[-1]
    pm = p[:, 1:r - 1, :]
    vs = p[:, 0:r - 2, :] + pm + pm + p[:, 2:r, :]        # vertical [1, 2, 1]
    vd = p[:, 0:r - 2, :] - p[:, 2:r, :]                  # vertical [1, 0, -1]
    vdm = vd[:, :, 1:w - 1]
    gx = vs[:, :, 0:w - 2] - vs[:, :, 2:w]                # horizontal [1, 0, -1]
    gy = vd[:, :, 0:w - 2] + vdm + vdm + vd[:, :, 2:w]    # horizontal [1, 2, 1]
    return jnp.sqrt(gx * gx + gy * gy)


def _edge_mag_rolled(p):
    """Sobel edge magnitude over a full row tile using wrap-around XLU rolls
    (separable [1,2,1] x [1,0,-1] taps; rolls co-issue with the VPU adds).
    Rows >= t-2 and cols >= w-2 of the result wrapped and are garbage -- the
    caller masks them (rows t-2 / t-1 are produced by _edge_mag_tail)."""
    t, w = p.shape[-2], p.shape[-1]
    p1 = pltpu.roll(p, t - 1, axis=1)                     # p1[i] = p[i+1 mod t]
    p2 = pltpu.roll(p, t - 2, axis=1)                     # p2[i] = p[i+2 mod t]
    vs = p + p1 + p1 + p2                                 # vertical [1, 2, 1]
    vd = p - p2                                           # vertical [1, 0, -1]
    vs2 = pltpu.roll(vs, w - 2, axis=2)
    vd1 = pltpu.roll(vd, w - 1, axis=2)
    vd2 = pltpu.roll(vd, w - 2, axis=2)
    gx = vs - vs2                                         # horizontal [1, 0, -1]
    gy = vd + vd1 + vd1 + vd2                             # horizontal [1, 2, 1]
    return jnp.sqrt(gx * gx + gy * gy)


def _edge_mag_tail(tail, halo2):
    """Sobel edge magnitude for the last 8 rows of a tile, with the two rows
    *below* the tile supplied in halo2 (Bt, 2, W).  Only output rows 6 and 7
    (the two tile rows whose 3x3 window crosses the tile boundary) are used by
    the caller; cols >= w-2 wrap and are masked by the caller."""
    w = tail.shape[-1]
    t1 = pltpu.roll(tail, 7, axis=1)                      # tail[i+1 mod 8]
    t2 = pltpu.roll(tail, 6, axis=1)                      # tail[i+2 mod 8]
    ri = lax.broadcasted_iota(jnp.int32, (1, 8, 1), 1)
    h0 = jnp.broadcast_to(halo2[:, 0:1, :], tail.shape)
    h1 = jnp.broadcast_to(halo2[:, 1:2, :], tail.shape)
    t1 = jnp.where(ri == 7, h0, t1)                       # cheap: 8-row arrays
    t2 = jnp.where(ri == 6, h0, t2)
    t2 = jnp.where(ri == 7, h1, t2)
    vs = tail + t1 + t1 + t2
    vd = tail - t2
    vs2 = pltpu.roll(vs, w - 2, axis=2)
    vd1 = pltpu.roll(vd, w - 1, axis=2)
    vd2 = pltpu.roll(vd, w - 2, axis=2)
    gx = vs - vs2
    gy = vd + vd1 + vd1 + vd2
    return jnp.sqrt(gx * gx + gy * gy)


def _lane_partial(x):
    """(Bt, R, W) -> (1, 1, W) partial sum; keeps the lane axis dense so the
    per-step store is an unmasked wide vst instead of a single-lane write."""
    return jnp.sum(jnp.sum(x, axis=1, keepdims=True), axis=0, keepdims=True)


# ----------------------------------------------------------------------------
# kernels
# ----------------------------------------------------------------------------
def _sobel_small_kernel(src_ref, tgt_ref, out_ref):
    """Whole (batch-packed) image per grid step; interior-only computation."""
    edge_s = _edge_mag_interior(_channel_sum(src_ref[...]))
    edge_t = _edge_mag_interior(_channel_sum(tgt_ref[...]))
    err = jnp.abs(edge_s - edge_t)                        # == sqrt(diff*diff)
    part = _lane_partial(err)                             # (1, 1, W-2)
    out_ref[...] = jnp.reshape(part, (1, 1, 1, part.shape[-1]))


def _sobel_tiled_kernel(src_ref, src_halo_ref, tgt_ref, tgt_halo_ref, out_ref,
                        *, img_h, valid_w):
    """Row-tiled path: (1, C, tile_h, Wp) main block + (1, C, hb, Wp) halo."""
    r = pl.program_id(1)
    t = src_ref.shape[2]
    w = src_ref.shape[3]

    p_src = _channel_sum(src_ref[...])                    # (Bt, t, Wp) f32
    p_tgt = _channel_sum(tgt_ref[...])

    col_ok = lax.broadcasted_iota(jnp.int32, (1, 1, w), 2) < (valid_w - 2)
    rows_left = img_h - 2 - r * t          # valid conv-output rows in this tile

    # ---- bulk: output rows 0..t-3 (3x3 windows fully inside the tile) ------
    err_bulk = jnp.abs(_edge_mag_rolled(p_src) - _edge_mag_rolled(p_tgt))
    row_ok = (lax.broadcasted_iota(jnp.int32, (1, t, 1), 1)
              < jnp.minimum(rows_left, t - 2))
    bulk = _lane_partial(jnp.where(row_ok & col_ok, err_bulk, 0.0))

    # ---- boundary: output rows t-2, t-1 (windows cross into the halo) ------
    h_src = _channel_sum(src_halo_ref[:, :, 0:2, :])      # (Bt, 2, Wp)
    h_tgt = _channel_sum(tgt_halo_ref[:, :, 0:2, :])
    err_tail = jnp.abs(_edge_mag_tail(p_src[:, t - 8:, :], h_src)
                       - _edge_mag_tail(p_tgt[:, t - 8:, :], h_tgt))
    ti = lax.broadcasted_iota(jnp.int32, (1, 8, 1), 1)
    # tail row i is global output row r*t + (t-8) + i; keep only rows 6,7 that
    # are still inside the H-2 valid output rows.
    tail_ok = (ti >= 6) & (ti < rows_left - (t - 8))
    bound = _lane_partial(jnp.where(tail_ok & col_ok, err_tail, 0.0))

    out_ref[...] = jnp.reshape(bulk + bound, (1, 1, 1, w))


# ----------------------------------------------------------------------------
# wrapper
# ----------------------------------------------------------------------------
def l1_sobel_loss(source, target, *, tile_h=None, force_tiled=False):
    """source, target: (B, 3, H, W) -> scalar: sum(|edge(src)-edge(tgt)|) / B."""
    B, C, H, W = source.shape
    assert target.shape == source.shape
    assert C == 3, "Sobel loss expects 3 input channels"
    assert H >= 3 and W >= 3, "need at least a 3x3 image"

    in_itemsize = jnp.dtype(source.dtype).itemsize
    row_mult = max(8, 32 // in_itemsize)   # min sublane multiple for the dtype

    # ---- generation-aware VMEM budgets (v5e/v6e: 128 MiB, v7x: 64 MiB/TC) --
    try:
        vmem_cap = int(getattr(pltpu.get_tpu_info(), "vmem_capacity_bytes", 0))
    except Exception:                                     # pragma: no cover
        vmem_cap = 0
    if not vmem_cap:
        vmem_cap = 64 * 1024 * 1024                       # conservative (v7x)
    vmem_limit = max(32 * 1024 * 1024,
                     min(int(vmem_cap * 0.62), 88 * 1024 * 1024))
    step_budget = vmem_limit - 8 * 1024 * 1024            # compiler headroom

    lane_w = _round_up(W, 128)

    def whole_image_bytes(bb):
        # 2 inputs x 2 pipeline buffers of the block + ~14 live f32
        # intermediates in the body, all at layout-padded sizes.
        rows_p = _round_up(H, 8)
        return bb * (4 * C * rows_p * lane_w * in_itemsize
                     + 14 * rows_p * lane_w * 4)

    use_tiled = force_tiled or (whole_image_bytes(1) > 4 * 1024 * 1024
                                and H >= row_mult)
    # TODO(synk): huge images with H < row_mult still take the whole-image
    # path and can exceed the VMEM limit; pad H on the host for that regime.

    def cparams(sem):
        return pltpu.CompilerParams(dimension_semantics=sem,
                                    vmem_limit_bytes=vmem_limit)

    if use_tiled:
        Wp = lane_w
        if Wp != W:
            # host-pad W to a lane multiple; the column mask inside the kernel
            # uses the true width, so padded columns contribute nothing.
            pad = ((0, 0), (0, 0), (0, 0), (0, Wp - W))
            src_p, tgt_p = jnp.pad(source, pad), jnp.pad(target, pad)
        else:
            src_p, tgt_p = source, target

        hb = row_mult                                     # halo block rows
        if tile_h is None:
            halo_bytes = 4 * C * hb * Wp * in_itemsize
            per_row = (4 * C * in_itemsize + 14 * 4) * Wp
            max_rows = _round_down(
                max(step_budget - halo_bytes, per_row * row_mult) // per_row,
                row_mult)
            elems_cap = _round_down(max((1 << 19) // Wp, row_mult), row_mult)
            tile_h = max(row_mult,
                         min(_round_down(H, row_mult), elems_cap, max_rows))
        assert tile_h % row_mult == 0 and tile_h >= row_mult
        # TODO(synk): extremely wide single rows (W so large that even an
        # 8-row tile overflows VMEM) would additionally need column tiling.

        gr = pl.cdiv(H - 2, tile_h)
        n_hblocks = pl.cdiv(H, hb)
        halo_step = tile_h // hb

        main_spec = pl.BlockSpec((1, C, tile_h, Wp), lambda b, r: (b, 0, r, 0))
        # NOTE: the clamp hands the LAST row tile stale halo rows; that is safe
        # only because gr = cdiv(H-2, tile_h) guarantees every output row that
        # consumes those halo rows is masked out (tail_ok) inside the kernel.
        halo_spec = pl.BlockSpec(
            (1, C, hb, Wp),
            lambda b, r: (b, 0,
                          jnp.minimum((r + 1) * halo_step, n_hblocks - 1), 0))
        out_spec = pl.BlockSpec((1, 1, 1, Wp), lambda b, r: (b, r, 0, 0))

        kernel = functools.partial(_sobel_tiled_kernel, img_h=H, valid_w=W)
        partials = pl.pallas_call(
            kernel,
            out_shape=jax.ShapeDtypeStruct((B, gr, 1, Wp), jnp.float32),
            grid=(B, gr),
            in_specs=[main_spec, halo_spec, main_spec, halo_spec],
            out_specs=out_spec,
            compiler_params=cparams(("parallel", "parallel")),
        )(src_p, src_p, tgt_p, tgt_p)
    else:
        # small images: whole image per step; pack several batch elements per
        # step.  Padding the batch with zero images contributes exactly 0 to
        # the sum, so awkward batch sizes don't force one image per step.
        small_budget = min(step_budget, 16 * 1024 * 1024)
        bb = int(max(1, min(B, 256, small_budget // whole_image_bytes(1))))
        Bp = _round_up(B, bb)
        if Bp != B:
            pad = ((0, Bp - B), (0, 0), (0, 0), (0, 0))
            src_p, tgt_p = jnp.pad(source, pad), jnp.pad(target, pad)
        else:
            src_p, tgt_p = source, target
        gb = Bp // bb

        main_spec = pl.BlockSpec((bb, C, H, W), lambda b: (b, 0, 0, 0))
        out_spec = pl.BlockSpec((1, 1, 1, W - 2), lambda b: (b, 0, 0, 0))
        partials = pl.pallas_call(
            _sobel_small_kernel,
            out_shape=jax.ShapeDtypeStruct((gb, 1, 1, W - 2), jnp.float32),
            grid=(gb,),
            in_specs=[main_spec, main_spec],
            out_specs=out_spec,
            compiler_params=cparams(("parallel",)),
        )(src_p, tgt_p)

    # lane-dense per-step partials reduced in plain JAX, then /B (PyTorch).
    return jnp.sum(partials) / B


# ----------------------------------------------------------------------------
# pure-JAX reference (mirrors the PyTorch forward) for validation
# ----------------------------------------------------------------------------
_SOBEL_X = [[1.0, 0.0, -1.0], [2.0, 0.0, -2.0], [1.0, 0.0, -1.0]]
_SOBEL_Y = [[1.0, 2.0, 1.0], [0.0, 0.0, 0.0], [-1.0, -2.0, -1.0]]


def _reference_loss(source, target):
    kx = jnp.asarray(_SOBEL_X, jnp.float32)
    ky = jnp.asarray(_SOBEL_Y, jnp.float32)
    wx = jnp.broadcast_to(kx, (1, 3, 3, 3))   # (O, I, kh, kw)
    wy = jnp.broadcast_to(ky, (1, 3, 3, 3))

    def conv(x, w):
        return lax.conv_general_dilated(
            x, w, window_strides=(1, 1), padding="VALID",
            dimension_numbers=("NCHW", "OIHW", "NCHW"))

    exx, exy = conv(source, wx), conv(source, wy)
    eyx, eyy = conv(target, wx), conv(target, wy)
    edge_x = jnp.sqrt(exx * exx + exy * exy)
    edge_y = jnp.sqrt(eyx * eyx + eyy * eyy)
    diff = edge_x - edge_y
    return jnp.sum(jnp.sqrt(diff * diff)) / source.shape[0]


if __name__ == "__main__":
    key = jax.random.PRNGKey(0)
    k1, k2, k3, k4 = jax.random.split(key, 4)

    # --- small / whole-image path -------------------------------------------
    B, C, H, W = 2, 3, 16, 16
    src_s = jax.random.uniform(k1, (B, C, H, W), jnp.float32)
    tgt_s = jax.random.uniform(k2, (B, C, H, W), jnp.float32)
    got_s = jax.block_until_ready(l1_sobel_loss(src_s, tgt_s))
    ref_s = jax.block_until_ready(_reference_loss(src_s, tgt_s))
    assert jnp.allclose(got_s, ref_s, rtol=3e-4, atol=1e-3), (got_s, ref_s)

    # --- row-tiled path (forced at a small shape: unaligned W -> host pad,
    #     partial last tile, clamped halo block) ------------------------------
    B2, H2, W2 = 2, 23, 200
    src_t = jax.random.uniform(k3, (B2, 3, H2, W2), jnp.float32)
    tgt_t = jax.random.uniform(k4, (B2, 3, H2, W2), jnp.float32)
    got_t = jax.block_until_ready(
        l1_sobel_loss(src_t, tgt_t, tile_h=8, force_tiled=True))
    ref_t = jax.block_until_ready(_reference_loss(src_t, tgt_t))
    assert jnp.allclose(got_t, ref_t, rtol=3e-4, atol=1e-2), (got_t, ref_t)

    print("KERNEL_OK")
</pallas_src>

<mosaic_0001>
module attributes {stable_mosaic.version = 11 : i64} {
  func.func @_sobel_small_kernel(%arg0: i32, %arg1: memref<2x3x16x16xf32, #tpu.memory_space<vmem>>, %arg2: memref<2x3x16x16xf32, #tpu.memory_space<vmem>>, %arg3: memref<1x1x1x14xf32, #tpu.memory_space<vmem>>) attributes {dimension_semantics = [#tpu.dimension_semantics<parallel>], iteration_bounds = array<i64: 1>, scalar_prefetch = 0 : i64, scratch_operands = 0 : i64, tpu.core_type = #tpu.core_type<tc>, window_params = [{transform_indices = @transform_0, window_bounds = array<i64: 2, 3, 16, 16>}, {transform_indices = @transform_1, window_bounds = array<i64: 2, 3, 16, 16>}, {transform_indices = @transform_2, window_bounds = array<i64: 1, 1, 1, 14>}]} {
    %c0 = arith.constant 0 : index
    %c0_0 = arith.constant 0 : index
    %c0_1 = arith.constant 0 : index
    %c0_2 = arith.constant 0 : index
    %0 = vector.load %arg1[%c0, %c0_0, %c0_1, %c0_2] : memref<2x3x16x16xf32, #tpu.memory_space<vmem>>, vector<2x3x16x16xf32>
    %1 = vector.extract_strided_slice %0 {offsets = [0, 0, 0, 0], sizes = [2, 1, 16, 16], strides = [1, 1, 1, 1]} : vector<2x3x16x16xf32> to vector<2x1x16x16xf32>
    %2 = vector.shape_cast %1 : vector<2x1x16x16xf32> to vector<2x16x16xf32>
    %3 = vector.extract_strided_slice %0 {offsets = [0, 1, 0, 0], sizes = [2, 1, 16, 16], strides = [1, 1, 1, 1]} : vector<2x3x16x16xf32> to vector<2x1x16x16xf32>
    %4 = vector.shape_cast %3 : vector<2x1x16x16xf32> to vector<2x16x16xf32>
    %5 = arith.addf %2, %4 : vector<2x16x16xf32>
    %6 = vector.extract_strided_slice %0 {offsets = [0, 2, 0, 0], sizes = [2, 1, 16, 16], strides = [1, 1, 1, 1]} : vector<2x3x16x16xf32> to vector<2x1x16x16xf32>
    %7 = vector.shape_cast %6 : vector<2x1x16x16xf32> to vector<2x16x16xf32>
    %8 = arith.addf %5, %7 : vector<2x16x16xf32>
    %9 = vector.extract_strided_slice %8 {offsets = [0, 1, 0], sizes = [2, 14, 16], strides = [1, 1, 1]} : vector<2x16x16xf32> to vector<2x14x16xf32>
    %10 = vector.extract_strided_slice %8 {offsets = [0, 0, 0], sizes = [2, 14, 16], strides = [1, 1, 1]} : vector<2x16x16xf32> to vector<2x14x16xf32>
    %11 = arith.addf %10, %9 : vector<2x14x16xf32>
    %12 = arith.addf %11, %9 : vector<2x14x16xf32>
    %13 = vector.extract_strided_slice %8 {offsets = [0, 2, 0], sizes = [2, 14, 16], strides = [1, 1, 1]} : vector<2x16x16xf32> to vector<2x14x16xf32>
    %14 = arith.addf %12, %13 : vector<2x14x16xf32>
    %15 = vector.extract_strided_slice %8 {offsets = [0, 0, 0], sizes = [2, 14, 16], strides = [1, 1, 1]} : vector<2x16x16xf32> to vector<2x14x16xf32>
    %16 = vector.extract_strided_slice %8 {offsets = [0, 2, 0], sizes = [2, 14, 16], strides = [1, 1, 1]} : vector<2x16x16xf32> to vector<2x14x16xf32>
    %17 = arith.subf %15, %16 : vector<2x14x16xf32>
    %18 = vector.extract_strided_slice %17 {offsets = [0, 0, 1], sizes = [2, 14, 14], strides = [1, 1, 1]} : vector<2x14x16xf32> to vector<2x14x14xf32>
    %19 = vector.extract_strided_slice %14 {offsets = [0, 0, 0], sizes = [2, 14, 14], strides = [1, 1, 1]} : vector<2x14x16xf32> to vector<2x14x14xf32>
    %20 = vector.extract_strided_slice %14 {offsets = [0, 0, 2], sizes = [2, 14, 14], strides = [1, 1, 1]} : vector<2x14x16xf32> to vector<2x14x14xf32>
    %21 = arith.subf %19, %20 : vector<2x14x14xf32>
    %22 = vector.extract_strided_slice %17 {offsets = [0, 0, 0], sizes = [2, 14, 14], strides = [1, 1, 1]} : vector<2x14x16xf32> to vector<2x14x14xf32>
    %23 = arith.addf %22, %18 : vector<2x14x14xf32>
    %24 = arith.addf %23, %18 : vector<2x14x14xf32>
    %25 = vector.extract_strided_slice %17 {offsets = [0, 0, 2], sizes = [2, 14, 14], strides = [1, 1, 1]} : vector<2x14x16xf32> to vector<2x14x14xf32>
    %26 = arith.addf %24, %25 : vector<2x14x14xf32>
    %27 = arith.mulf %21, %21 : vector<2x14x14xf32>
    %28 = arith.mulf %26, %26 : vector<2x14x14xf32>
    %29 = arith.addf %27, %28 : vector<2x14x14xf32>
    %30 = math.sqrt %29 : vector<2x14x14xf32>
    %c0_3 = arith.constant 0 : index
    %c0_4 = arith.constant 0 : index
    %c0_5 = arith.constant 0 : index
    %c0_6 = arith.constant 0 : index
    %31 = vector.load %arg2[%c0_3, %c0_4, %c0_5, %c0_6] : memref<2x3x16x16xf32, #tpu.memory_space<vmem>>, vector<2x3x16x16xf32>
    %32 = vector.extract_strided_slice %31 {offsets = [0, 0, 0, 0], sizes = [2, 1, 16, 16], strides = [1, 1, 1, 1]} : vector<2x3x16x16xf32> to vector<2x1x16x16xf32>
    %33 = vector.shape_cast %32 : vector<2x1x16x16xf32> to vector<2x16x16xf32>
    %34 = vector.extract_strided_slice %31 {offsets = [0, 1, 0, 0], sizes = [2, 1, 16, 16], strides = [1, 1, 1, 1]} : vector<2x3x16x16xf32> to vector<2x1x16x16xf32>
    %35 = vector.shape_cast %34 : vector<2x1x16x16xf32> to vector<2x16x16xf32>
    %36 = arith.addf %33, %35 : vector<2x16x16xf32>
    %37 = vector.extract_strided_slice %31 {offsets = [0, 2, 0, 0], sizes = [2, 1, 16, 16], strides = [1, 1, 1, 1]} : vector<2x3x16x16xf32> to vector<2x1x16x16xf32>
    %38 = vector.shape_cast %37 : vector<2x1x16x16xf32> to vector<2x16x16xf32>
    %39 = arith.addf %36, %38 : vector<2x16x16xf32>
    %40 = vector.extract_strided_slice %39 {offsets = [0, 1, 0], sizes = [2, 14, 16], strides = [1, 1, 1]} : vector<2x16x16xf32> to vector<2x14x16xf32>
    %41 = vector.extract_strided_slice %39 {offsets = [0, 0, 0], sizes = [2, 14, 16], strides = [1, 1, 1]} : vector<2x16x16xf32> to vector<2x14x16xf32>
    %42 = arith.addf %41, %40 : vector<2x14x16xf32>
    %43 = arith.addf %42, %40 : vector<2x14x16xf32>
    %44 = vector.extract_strided_slice %39 {offsets = [0, 2, 0], sizes = [2, 14, 16], strides = [1, 1, 1]} : vector<2x16x16xf32> to vector<2x14x16xf32>
    %45 = arith.addf %43, %44 : vector<2x14x16xf32>
    %46 = vector.extract_strided_slice %39 {offsets = [0, 0, 0], sizes = [2, 14, 16], strides = [1, 1, 1]} : vector<2x16x16xf32> to vector<2x14x16xf32>
    %47 = vector.extract_strided_slice %39 {offsets = [0, 2, 0], sizes = [2, 14, 16], strides = [1, 1, 1]} : vector<2x16x16xf32> to vector<2x14x16xf32>
    %48 = arith.subf %46, %47 : vector<2x14x16xf32>
    %49 = vector.extract_strided_slice %48 {offsets = [0, 0, 1], sizes = [2, 14, 14], strides = [1, 1, 1]} : vector<2x14x16xf32> to vector<2x14x14xf32>
    %50 = vector.extract_strided_slice %45 {offsets = [0, 0, 0], sizes = [2, 14, 14], strides = [1, 1, 1]} : vector<2x14x16xf32> to vector<2x14x14xf32>
    %51 = vector.extract_strided_slice %45 {offsets = [0, 0, 2], sizes = [2, 14, 14], strides = [1, 1, 1]} : vector<2x14x16xf32> to vector<2x14x14xf32>
    %52 = arith.subf %50, %51 : vector<2x14x14xf32>
    %53 = vector.extract_strided_slice %48 {offsets = [0, 0, 0], sizes = [2, 14, 14], strides = [1, 1, 1]} : vector<2x14x16xf32> to vector<2x14x14xf32>
    %54 = arith.addf %53, %49 : vector<2x14x14xf32>
    %55 = arith.addf %54, %49 : vector<2x14x14xf32>
    %56 = vector.extract_strided_slice %48 {offsets = [0, 0, 2], sizes = [2, 14, 14], strides = [1, 1, 1]} : vector<2x14x16xf32> to vector<2x14x14xf32>
    %57 = arith.addf %55, %56 : vector<2x14x14xf32>
    %58 = arith.mulf %52, %52 : vector<2x14x14xf32>
    %59 = arith.mulf %57, %57 : vector<2x14x14xf32>
    %60 = arith.addf %58, %59 : vector<2x14x14xf32>
    %61 = math.sqrt %60 : vector<2x14x14xf32>
    %62 = arith.subf %30, %61 : vector<2x14x14xf32>
    %63 = math.absf %62 : vector<2x14x14xf32>
    %cst = arith.constant dense<0.000000e+00> : vector<2x14xf32>
    %64 = vector.multi_reduction <add>, %63, %cst [1] : vector<2x14x14xf32> to vector<2x14xf32>
    %65 = vector.shape_cast %64 : vector<2x14xf32> to vector<2x1x14xf32>
    %cst_7 = arith.constant dense<0.000000e+00> : vector<1x14xf32>
    %66 = vector.multi_reduction <add>, %65, %cst_7 [0] : vector<2x1x14xf32> to vector<1x14xf32>
    %67 = vector.shape_cast %66 : vector<1x14xf32> to vector<1x1x14xf32>
    %68 = vector.shape_cast %67 : vector<1x1x14xf32> to vector<1x1x1x14xf32>
    %c0_8 = arith.constant 0 : index
    %c0_9 = arith.constant 0 : index
    %c0_10 = arith.constant 0 : index
    %c0_11 = arith.constant 0 : index
    %69 = vector.load %arg3[%c0_8, %c0_9, %c0_10, %c0_11] : memref<1x1x1x14xf32, #tpu.memory_space<vmem>>, vector<1x1x1x14xf32>
    tpu.vector_store %arg3[%c0_8, %c0_9, %c0_10, %c0_11], %68 {strides = array<i32>} : memref<1x1x1x14xf32, #tpu.memory_space<vmem>>, vector<1x1x1x14xf32>,
    return
  }
  func.func @transform_0(%arg0: i32) -> (i32, i32, i32, i32) {
    %c0_i32 = arith.constant 0 : i32
    %c0_i32_0 = arith.constant 0 : i32
    %c0_i32_1 = arith.constant 0 : i32
    %c0_i32_2 = arith.constant 0 : i32
    return %arg0, %c0_i32, %c0_i32_0, %c0_i32_1 : i32, i32, i32, i32
  }
  func.func @transform_1(%arg0: i32) -> (i32, i32, i32, i32) {
    %c0_i32 = arith.constant 0 : i32
    %c0_i32_0 = arith.constant 0 : i32
    %c0_i32_1 = arith.constant 0 : i32
    %c0_i32_2 = arith.constant 0 : i32
    return %arg0, %c0_i32, %c0_i32_0, %c0_i32_1 : i32, i32, i32, i32
  }
  func.func @transform_2(%arg0: i32) -> (i32, i32, i32, i32) {
    %c0_i32 = arith.constant 0 : i32
    %c0_i32_0 = arith.constant 0 : i32
    %c0_i32_1 = arith.constant 0 : i32
    %c0_i32_2 = arith.constant 0 : i32
    return %arg0, %c0_i32, %c0_i32_0, %c0_i32_1 : i32, i32, i32, i32
  }
}

</mosaic_0001>

<bundles_post_ra>
// kernel: tpu_custom_call.1
= control target key start
LH: loop header
LB: loop body
LE: loop exit
PB: predicated region body
PF: predicated region fallthrough
CT: control target
= control target key end

     0   :  { %7 = vsyncpa [#allocation3], 0  ;;  %s814_s0 = inlined_call_operand.hbm [shape: f32[2,3,16,16], index: 0, kind: input, shape index: {}]   ;;  %s815_s1 = inlined_call_operand.hbm [shape: f32[2,3,16,16], index: 1, kind: input, shape index: {}]   ;;  %s816_s2 = inlined_call_operand.hbm [shape: f32[1,1,1,14], index: 2, kind: output, shape index: {}]  }
   0x1   :  { %8 = vsyncpa [#allocation6], 0 }
   0x2   :  { %9 = vsyncpa [#allocation4], 0  ;;  %s14_s11 = sshll.u32 %s814_s0, 4  ;;  %s558_s12 = smov [#allocation2]   ;;  %s15_s11 = int_to_ptr.hbm [resolvable:$true] %s14_s11 }
   0x3   :  { %s16_s13 = sshll.u32 %s558_s12, 4  ;;  %s27_s16 = sshll.u32 %s815_s1, 4  ;;  %s17_s13 = int_to_ptr.vmem [resolvable:$true] %s16_s13  ;;  %s28_s16 = int_to_ptr.hbm [resolvable:$true] %s27_s16 }
   0x4   :  { %s559_s17 = smov 128   ;;  %s560_s18 = smov 8  }
   0x5   :  { %22 = dma.hbm_to_vmem [thread:$0]  %s15_s11, 1536, %s17_s13, [#allocation3], %s559_s17, %s559_s17, %s560_s18  }
   0x6   :  { %s561_s19 = smov [#allocation5]  }
   0x7   :  { %s29_s20 = sshll.u32 %s561_s19, 4  ;;  %s30_s20 = int_to_ptr.vmem [resolvable:$true] %s29_s20 }
   0x8   :  { %35 = dma.hbm_to_vmem [thread:$0]  %s28_s16, 1536, %s30_s20, [#allocation6], %s559_s17, %s559_s17, %s560_s18  }
   0x9   :  { %552 = dma.done.wait [#allocation3], 1536  }
   0xa   :  { %553 = vsyncadd [#allocation3], 4294965760 }
   0xb   :  { %554 = dma.done.wait [#allocation6], 1536  }
   0xc   :  { %555 = vsyncadd [#allocation6], 4294965760  ;;  %v227_v0 = vld [vmem:[#allocation5 + $0x8] sm:$0xff]  ;;  %v229_v1 = vld [vmem:[#allocation5 + $0x18] sm:$0xff]  ;;  %vm87_vm0 = vcmask 1045504   ;;  %s562_s0 = smov 127  }
   0xd   :  { %v231_v2 = vld [vmem:[#allocation5 + $0x28] sm:$0xff]  ;;  %v239_v3 = vadd.f32 %v229_v1, %v227_v0  ;;  %v51_v4 = vld [vmem:[#allocation2 + $0x38] sm:$0xff]  ;;  %v226_v13 = vld [vmem:[#allocation5] sm:$0xff]  ;;  %vm68_vm1 = vcmask 1046528   ;;  %s563_s1 = smov 126   ;;  %s564_s21 = smov [#allocation7]  }
   0xe   :  { %v53_v5 = vld [vmem:[#allocation2 + $0x48] sm:$0xff]  ;;  %v55_v6 = vld [vmem:[#allocation2 + $0x58] sm:$0xff]  ;;  %v228_v14 = vld [vmem:[#allocation5 + $0x10] sm:$0xff]  ;;  %s444_s22 = sshll.u32 %s564_s21, 4  ;;  %s446_s25 = sshll.u32 %s816_s2, 4  ;;  %s445_s22 = int_to_ptr.vmem [resolvable:$true] %s444_s22  ;;  %s447_s25 = int_to_ptr.hbm [resolvable:$true] %s446_s25 }
   0xf   :  { %v59_v7 = vadd.f32 %v53_v5, %v51_v4  ;;  %v45_v8 = vld [vmem:[#allocation2 + $0x8] sm:$0xff]  ;;  %v47_v9 = vld [vmem:[#allocation2 + $0x18] sm:$0xff]  ;;  %v586_v11 = vadd.f32 %v239_v3, %v231_v2  ;;  %v230_v15 = vld [vmem:[#allocation5 + $0x20] sm:$0xff]  ;;  %v238_v17 = vadd.f32 %v228_v14, %v226_v13 }
  0x10   :  { %v49_v10 = vld [vmem:[#allocation2 + $0x28] sm:$0xff]  ;;  %v57_v12 = vadd.f32 %v47_v9, %v45_v8  ;;  %v233_v18 = vld [vmem:[#allocation5 + $0x38] sm:$0xff]  ;;  %v44_v24 = vld [vmem:[#allocation2] sm:$0xff] }
  0x11   :  { %v63_v16 = vadd.f32 %v59_v7, %v55_v6  ;;  %v235_v19 = vld [vmem:[#allocation5 + $0x48] sm:$0xff]  ;;  %v237_v20 = vld [vmem:[#allocation5 + $0x58] sm:$0xff]  ;;  %v589_v21 = vrot.slane %v586_v11, 2  ;;  %v46_v25 = vld [vmem:[#allocation2 + $0x10] sm:$0xff]  ;;  %v591_v28 = vadd.f32 %v238_v17, %v230_v15 }
  0x12   :  { %v61_v22 = vadd.f32 %v57_v12, %v49_v10  ;;  %v241_v23 = vadd.f32 %v235_v19, %v233_v18  ;;  %v48_v26 = vld [vmem:[#allocation2 + $0x20] sm:$0xff]  ;;  %v56_v29 = vadd.f32 %v46_v25, %v44_v24  ;;  %v50_v30 = vld [vmem:[#allocation2 + $0x30] sm:$0xff] }
  0x13   :  { %v92_v27 = vrot.slane %v63_v16, 2  ;;  %v52_v31 = vld [vmem:[#allocation2 + $0x40] sm:$0xff]  ;;  %v595_v32 = vsub.f32 %v586_v11, %v589_v21  ;;  %v232_v36 = vld [vmem:[#allocation5 + $0x30] sm:$0xff]  ;;  %v268_v39 = vrot.slane %v591_v28, 2  ;;  %v73_v60 = vrot.slane %v63_v16, 1 }
  0x14   :  { %v89_v33 = vrot.slane %v61_v22, 2  ;;  %v597_v34 = vadd.f32 %v241_v23, %v237_v20  ;;  %v58_v35 = vadd.f32 %v52_v31, %v50_v30  ;;  %v234_v37 = vld [vmem:[#allocation5 + $0x40] sm:$0xff]  ;;  %v60_v40 = vadd.f32 %v56_v29, %v48_v26  ;;  %v54_v41 = vld [vmem:[#allocation2 + $0x50] sm:$0xff] }
  0x15   :  { %v599_v38 = vsub.f32 %v63_v16, %v92_v27  ;;  %v240_v42 = vadd.f32 %v234_v37, %v232_v36  ;;  %312 = vrot.lane.b32.xlu2 %v595_v32, %s562_s0  ;;  %v236_v44 = vld [vmem:[#allocation5 + $0x50] sm:$0xff]  ;;  %v70_v45 = vrot.slane %v61_v22, 1  ;;  %v270_v46 = vsel %vm87_vm0, %v268_v39, %v589_v21 }
  0x16   :  { %v604_v43 = vsub.f32 %v61_v22, %v89_v33  ;;  %v611_v47 = vrot.slane %v597_v34, 2  ;;  %v88_v48 = vrot.slane %v60_v40, 2  ;;  %v69_v49 = vrot.slane %v60_v40, 1 }
  0x17   :  { %136 = vrot.lane.b32.xlu1 %v599_v38, %s562_s0  ;;  %v62_v50 = vadd.f32 %v58_v35, %v54_v41  ;;  %v244_v52 = vadd.f32 %v240_v42, %v236_v44  ;;  %v618_v54 = vsub.f32 %v591_v28, %v270_v46  ;;  %v82_v3 = vadd.f32 %v73_v60, %v63_v16 }
  0x18   :  { %132 = vrot.lane.b32.xlu0 %v604_v43, %s562_s0  ;;  %v90_v51 = vsel %vm87_vm0, %v88_v48, %v89_v33  ;;  %v71_v53 = vsel %vm68_vm1, %v69_v49, %v70_v45  ;;  %v622_v56 = vsub.f32 %v597_v34, %v611_v47  ;;  %v80_v7 = vadd.f32 %v70_v45, %v61_v22 }
  0x19   :  { %v79_v55 = vadd.f32 %v71_v53, %v60_v40  ;;  %v624_v57 = vsub.f32 %v60_v40, %v90_v51  ;;  %v91_v58 = vrot.slane %v62_v50, 2  ;;  %v72_v59 = vrot.slane %v62_v50, 1 }
  0x1a   :  { %v271_v61 = vrot.slane %v244_v52, 2  ;;  %v86_v8 = vadd.f32 %v82_v3, %v73_v60  ;;  %v84_v10 = vadd.f32 %v80_v7, %v70_v45  ;;  %v250_v15 = vrot.slane %v591_v28, 1 }
  0x1b   :  { %v83_v62 = vadd.f32 %v79_v55, %v71_v53  ;;  %v93_v63 = vsel %vm87_vm0, %v91_v58, %v92_v27  ;;  %v74_v0 = vsel %vm68_vm1, %v72_v59, %v73_v60  ;;  %v251_v16 = vrot.slane %v586_v11, 1 }
  0x1c   :  { %v273_v1 = vsel %vm87_vm0, %v271_v61, %v611_v47  ;;  %v104_v4 = vsub.f32 %v62_v50, %v93_v63  ;;  %v81_v5 = vadd.f32 %v74_v0, %v62_v50  ;;  %v645_v12 = vadd.f32 %v92_v27, %v86_v8 }
  0x1d   :  { %310 = vrot.lane.b32.xlu2 %v618_v54, %s562_s0  ;;  %v636_v2 = vadd.f32 %v90_v51, %v83_v62  ;;  %v638_v6 = vsub.f32 %v244_v52, %v273_v1  ;;  %v647_v14 = vadd.f32 %v89_v33, %v84_v10  ;;  %v252_v17 = vsel %vm68_vm1, %v250_v15, %v251_v16 }
  0x1e   :  { %v85_v9 = vadd.f32 %v81_v5, %v74_v0  ;;  %v261_v18 = vadd.f32 %v251_v16, %v586_v11  ;;  %v260_v19 = vadd.f32 %v252_v17, %v591_v28  ;;  %v254_v20 = vrot.slane %v597_v34, 1 }
  0x1f   :  { %316 = vrot.lane.b32.xlu1 %v622_v56, %s562_s0  ;;  %v253_v22 = vrot.slane %v244_v52, 1 }
  0x20   :  { %130 = vrot.lane.b32.xlu0 %v624_v57, %s562_s0  ;;  %v100_v13 = vadd.f32 %v93_v63, %v85_v9  ;;  %v265_v23 = vadd.f32 %v261_v18, %v251_v16  ;;  %v264_v24 = vadd.f32 %v260_v19, %v252_v17  ;;  %v263_v27 = vadd.f32 %v254_v20, %v597_v34 }
  0x21   :  { %v255_v25 = vsel %vm68_vm1, %v253_v22, %v254_v20 }
  0x22   :  { %v667_v26 = vadd.f32 %v589_v21, %v265_v23  ;;  %v278_v11 = vadd.f32 %v270_v46, %v264_v24  ;;  %v262_v28 = vadd.f32 %v255_v25, %v244_v52  ;;  %v267_v29 = vadd.f32 %v263_v27, %v254_v20 }
  0x24   :  { %v266_v30 = vadd.f32 %v262_v28, %v255_v25  ;;  %v676_v31 = vadd.f32 %v611_v47, %v267_v29 }
  0x25   :  { %110 = vrot.lane.b32.xlu2 %v636_v2, %s563_s1 }
  0x26   :  { %v678_v33 = vadd.f32 %v273_v1, %v266_v30 }
  0x27   :  { %134 = vrot.lane.b32.xlu1 %v104_v4, %s562_s0 }
  0x28   :  { %314 = vrot.lane.b32.xlu0 %v638_v6, %s562_s0 }
  0x2d   :  { %116 = vrot.lane.b32.xlu2 %v645_v12, %s563_s1 }
  0x2f   :  { %114 = vrot.lane.b32.xlu1 %v100_v13, %s563_s1 }
  0x30   :  { %112 = vrot.lane.b32.xlu0 %v647_v14, %s563_s1 }
  0x35   :  { %154 = vrot.lane.b32.xlu2 %v104_v4, %s563_s1 }
  0x37   :  { %152 = vrot.lane.b32.xlu1 %v604_v43, %s563_s1 }
  0x38   :  { %150 = vrot.lane.b32.xlu0 %v624_v57, %s563_s1 }
  0x3d   :  { %292 = vrot.lane.b32.xlu2 %v667_v26, %s563_s1 }
  0x3f   :  { %290 = vrot.lane.b32.xlu1 %v278_v11, %s563_s1 }
  0x40   :  { %156 = vrot.lane.b32.xlu0 %v599_v38, %s563_s1 }
  0x45   :  { %330 = vrot.lane.b32.xlu2 %v618_v54, %s563_s1 }
  0x47   :  { %296 = vrot.lane.b32.xlu1 %v676_v31, %s563_s1 }
  0x48   :  { %294 = vrot.lane.b32.xlu0 %v678_v33, %s563_s1 }
  0x4d   :  { %336 = vrot.lane.b32.xlu2 %v622_v56, %s563_s1 }
  0x4f   :  { %334 = vrot.lane.b32.xlu1 %v638_v6, %s563_s1 }
  0x50   :  { %332 = vrot.lane.b32.xlu0 %v595_v32, %s563_s1 }
  0x6f   :  { %v692_v21 = vpop.permute.xlu2 %312 }
  0x77   :  { %v311_v34 = vpop.permute.xlu2 %310 }
  0x78   :  { %v322_v59 = vadd.f32 %v311_v34, %v618_v54 }
  0x7f   :  { %v111_v35 = vpop.permute.xlu2 %110 }
  0x80   :  { %v122_v62 = vsub.f32 %v636_v2, %v111_v35 }
  0x82   :  { %v166_v8 = vmul.f32 %v122_v62, %v122_v62 }
  0x87   :  { %v117_v39 = vpop.permute.xlu2 %116 }
  0x89   :  { %v137_v36 = vpop.permute.xlu1 %136 }
  0x8a   :  { %v133_v37 = vpop.permute.xlu0 %132 }
  0x8b   :  { %v143_v50 = vadd.f32 %v133_v37, %v604_v43 }
  0x8d   :  { %v147_v53 = vadd.f32 %v143_v50, %v133_v37 }
  0x8f   :  { %v155_v42 = vpop.permute.xlu2 %154 }
  0x91   :  { %v317_v40 = vpop.permute.xlu1 %316 }
  0x92   :  { %v131_v41 = vpop.permute.xlu0 %130  ;;  %v325_v18 = vadd.f32 %v317_v40, %v622_v56 }
  0x93   :  { %v142_v51 = vadd.f32 %v131_v41, %v624_v57  ;;  %v326_v57 = vadd.f32 %v322_v59, %v311_v34 }
  0x94   :  { %v329_v28 = vadd.f32 %v325_v18, %v317_v40 }
  0x95   :  { %v146_v55 = vadd.f32 %v142_v51, %v131_v41 }
  0x97   :  { %v696_v46 = vpop.permute.xlu2 %292 }
  0x99   :  { %v135_v44 = vpop.permute.xlu1 %134 }
  0x9a   :  { %v694_v45 = vpop.permute.xlu0 %314  ;;  %v144_v49 = vadd.f32 %v135_v44, %v104_v4  ;;  %v145_v4 = vadd.f32 %v137_v36, %v599_v38 }
  0x9c   :  { %v148_v52 = vadd.f32 %v144_v49, %v135_v44  ;;  %v149_v54 = vadd.f32 %v145_v4, %v137_v36  ;;  %v323_v44 = vadd.f32 %v692_v21, %v595_v32 }
  0x9e   :  { %v164_v3 = vadd.f32 %v155_v42, %v148_v52  ;;  %v327_v32 = vadd.f32 %v323_v44, %v692_v21 }
  0x9f   :  { %v331_v63 = vpop.permute.xlu2 %330 }
  0xa0   :  { %v172_v10 = vmul.f32 %v164_v3, %v164_v3  ;;  %v342_v15 = vadd.f32 %v331_v63, %v326_v57 }
  0xa1   :  { %v115_v47 = vpop.permute.xlu1 %114 }
  0xa2   :  { %v113_v48 = vpop.permute.xlu0 %112  ;;  %v124_v60 = vsub.f32 %v100_v13, %v115_v47  ;;  %v125_v13 = vsub.f32 %v645_v12, %v117_v39  ;;  %v350_v23 = vmul.f32 %v342_v15, %v342_v15  ;;  %v324_v39 = vadd.f32 %v694_v45, %v638_v6 }
  0xa3   :  { %v123_v43 = vsub.f32 %v647_v14, %v113_v48 }
  0xa4   :  { %v168_v7 = vmul.f32 %v124_v60, %v124_v60  ;;  %v169_v25 = vmul.f32 %v125_v13, %v125_v13  ;;  %v328_v52 = vadd.f32 %v324_v39, %v694_v45 }
  0xa5   :  { %v167_v16 = vmul.f32 %v123_v43, %v123_v43 }
  0xa6   :  { %v708_v19 = vadd.f32 %v172_v10, %v168_v7 }
  0xa7   :  { %v337_v27 = vpop.permute.xlu2 %336 }
  0xa8   :  { %vm209_vm2 = vcmp.eq.f32.partialorder %v708_v19, inf  ;;  %vm211_vm8 = vcmp.eq.f32.partialorder %v708_v19, 0.0 }
  0xa9   :  { %v153_v58 = vpop.permute.xlu1 %152 }
  0xaa   :  { %v151_v61 = vpop.permute.xlu0 %150  ;;  %v163_v0 = vadd.f32 %v153_v58, %v147_v53 }
  0xab   :  { %v162_v1 = vadd.f32 %v151_v61, %v146_v55  ;;  %v303_v55 = vsub.f32 %v667_v26, %v696_v46 }
  0xac   :  { %v171_v9 = vmul.f32 %v163_v0, %v163_v0 }
  0xad   :  { %v170_v5 = vmul.f32 %v162_v1, %v162_v1 }
  0xae   :  { %v710_v20 = vadd.f32 %v171_v9, %v167_v16 }
  0xaf   :  { %v705_v2 = vadd.f32 %v170_v5, %v166_v8 }
  0xb0   :  { %vm197_vm4 = vcmp.eq.f32.partialorder %v710_v20, inf  ;;  %vm199_vm10 = vcmp.eq.f32.partialorder %v710_v20, 0.0 }
  0xb1   :  { %v291_v17 = vpop.permute.xlu1 %290  ;;  %464 = vrsqrt.f32 %v705_v2  ;;  %vm185_vm3 = vcmp.eq.f32.partialorder %v705_v2, inf  ;;  %vm187_vm13 = vcmp.eq.f32.partialorder %v705_v2, 0.0 }
  0xb2   :  { %v302_v38 = vsub.f32 %v278_v11, %v291_v17  ;;  %v157_v14 = vpop.permute.xlu0 %156  ;;  %466 = vrsqrt.f32 %v708_v19  ;;  %v345_v11 = vadd.f32 %v337_v27, %v329_v28 }
  0xb3   :  { %v165_v22 = vadd.f32 %v157_v14, %v149_v54  ;;  %468 = vrsqrt.f32 %v710_v20 }
  0xb4   :  { %v346_v24 = vmul.f32 %v302_v38, %v302_v38  ;;  %v353_v40 = vmul.f32 %v345_v11, %v345_v11 }
  0xb5   :  { %v173_v12 = vmul.f32 %v165_v22, %v165_v22 }
  0xb6   :  { %v714_v29 = vadd.f32 %v350_v23, %v346_v24 }
  0xb7   :  { %v717_v56 = vadd.f32 %v173_v12, %v169_v25  ;;  %v465_v36 = vpop.eup %464  ;;  %v212_v12 = vand.u32 2147483648, %v708_v19 }
  0xb8   :  { %470 = vrsqrt.f32 %v714_v29  ;;  %v467_v37 = vpop.eup %466  ;;  %v179_v48 = vmul.f32 %v465_v36, %v705_v2  ;;  %vm365_vm5 = vcmp.eq.f32.partialorder %v714_v29, inf  ;;  %vm367_vm6 = vcmp.eq.f32.partialorder %v714_v29, 0.0 }
  0xb9   :  { %472 = vrsqrt.f32 %v717_v56  ;;  %v297_v30 = vpop.permute.xlu1 %296  ;;  %v724_v42 = vpop.eup %468  ;;  %vm221_vm9 = vcmp.eq.f32.partialorder %v717_v56, inf  ;;  %vm223_vm12 = vcmp.eq.f32.partialorder %v717_v56, 0.0 }
  0xba   :  { %v305_v34 = vsub.f32 %v676_v31, %v297_v30  ;;  %v295_v35 = vpop.permute.xlu0 %294  ;;  %v203_v31 = vmul.f32 %v467_v37, %v708_v19  ;;  %v191_v58 = vmul.f32 %v724_v42, %v710_v20  ;;  %v180_v61 = vmul.f32 %v465_v36, %v179_v48 }
  0xbb   :  { %v304_v53 = vsub.f32 %v678_v33, %v295_v35  ;;  %v347_v33 = vmul.f32 %v303_v55, %v303_v55 }
  0xbc   :  { %v349_v41 = vmul.f32 %v305_v34, %v305_v34  ;;  %v204_v0 = vmul.f32 %v467_v37, %v203_v31  ;;  %v192_v21 = vmul.f32 %v724_v42, %v191_v58  ;;  %v181_v46 = vmul.f32 0.5, %v180_v61 }
  0xbd   :  { %v348_v4 = vmul.f32 %v304_v53, %v304_v53  ;;  %v200_v34 = vand.u32 2147483648, %v710_v20  ;;  %v224_v61 = vand.u32 2147483648, %v717_v56 }
  0xbe   :  { %v471_v47 = vpop.eup %470  ;;  %v729_v49 = vadd.f32 %v353_v40, %v349_v41  ;;  %v205_v8 = vmul.f32 0.5, %v204_v0  ;;  %v193_v54 = vmul.f32 0.5, %v192_v21  ;;  %v182_v17 = vsub.f32 1.5, %v181_v46 }
  0xbf   :  { %v473_v50 = vpop.eup %472  ;;  %v359_v51 = vmul.f32 %v471_v47, %v714_v29 }
  0xc0   :  { %v215_v6 = vmul.f32 %v473_v50, %v717_v56  ;;  %474 = vrsqrt.f32 %v729_v49  ;;  %v206_v18 = vsub.f32 1.5, %v205_v8  ;;  %v194_v22 = vsub.f32 1.5, %v193_v54 }
  0xc1   :  { %v360_v59 = vmul.f32 %v471_v47, %v359_v51  ;;  %v335_v60 = vpop.permute.xlu1 %334  ;;  %v183_v27 = vmul.f32 %v465_v36, %v182_v17  ;;  %vm401_vm7 = vcmp.eq.f32.partialorder %v729_v49, inf  ;;  %v404_v53 = vand.u32 2147483648, %v729_v49 }
  0xc2   :  { %v216_v62 = vmul.f32 %v473_v50, %v215_v6  ;;  %v344_v63 = vadd.f32 %v335_v60, %v328_v52  ;;  %v333_v45 = vpop.permute.xlu0 %332  ;;  %v207_v35 = vmul.f32 %v467_v37, %v206_v18  ;;  %v195_v36 = vmul.f32 %v724_v42, %v194_v22 }
  0xc3   :  { %v343_v1 = vadd.f32 %v333_v45, %v327_v32  ;;  %v361_v3 = vmul.f32 0.5, %v360_v59  ;;  %v184_v48 = vmul.f32 %v183_v27, %v705_v2  ;;  %v368_v6 = vand.u32 2147483648, %v714_v29 }
  0xc4   :  { %v352_v43 = vmul.f32 %v344_v63, %v344_v63  ;;  %v217_v5 = vmul.f32 0.5, %v216_v62  ;;  %v208_v31 = vmul.f32 %v207_v35, %v708_v19  ;;  %v196_v32 = vmul.f32 %v195_v36, %v710_v20 }
  0xc5   :  { %v351_v57 = vmul.f32 %v343_v1, %v343_v1  ;;  %v362_v15 = vsub.f32 1.5, %v361_v3  ;;  %vm403_vm11 = vcmp.eq.f32.partialorder %v729_v49, 0.0  ;;  %v186_v60 = vsel %vm185_vm3, %v705_v2, %v184_v48 }
  0xc6   :  { %v475_v26 = vpop.eup %474  ;;  %v743_v7 = vadd.f32 %v352_v43, %v348_v4  ;;  %v218_v13 = vsub.f32 1.5, %v217_v5  ;;  %v188_v63 = vand.u32 2147483648, %v705_v2  ;;  %v198_v43 = vsel %vm197_vm4, %v710_v20, %v196_v32 }
  0xc7   :  { %v395_v9 = vmul.f32 %v475_v26, %v729_v49  ;;  %v746_v10 = vadd.f32 %v351_v57, %v347_v33  ;;  %v363_v14 = vmul.f32 %v471_v47, %v362_v15  ;;  %vm414_vm3 = vcmask 113664  }
  0xc8   :  { %476 = vrsqrt.f32 %v743_v7  ;;  %v219_v23 = vmul.f32 %v473_v50, %v218_v13  ;;  %v189_v4 = vsel %vm187_vm13, %v188_v63, %v186_v60  ;;  %vm389_vm14 = vcmp.eq.f32.partialorder %v743_v7, inf }
  0xc9   :  { %v396_v16 = vmul.f32 %v475_v26, %v395_v9  ;;  %478 = vrsqrt.f32 %v746_v10  ;;  %v364_v40 = vmul.f32 %v363_v14, %v714_v29  ;;  %v392_v21 = vand.u32 2147483648, %v743_v7 }
  0xca   :  { %v220_v41 = vmul.f32 %v219_v23, %v717_v56  ;;  %vm377_vm15 = vcmp.eq.f32.partialorder %v746_v10, inf  ;;  %v380_v5 = vand.u32 2147483648, %v746_v10  ;;  %vm391_vm0 = vcmp.eq.f32.partialorder %v743_v7, 0.0 }
  0xcb   :  { %v397_v38 = vmul.f32 0.5, %v396_v16  ;;  %v366_v52 = vsel %vm365_vm5, %v714_v29, %v364_v40  ;;  %vm379_vm1 = vcmp.eq.f32.partialorder %v746_v10, 0.0  ;;  %v201_v9 = vsel %vm199_vm10, %v200_v34, %v198_v43 }
  0xcc   :  { %v222_v58 = vsel %vm221_vm9, %v717_v56, %v220_v41  ;;  %v369_v45 = vsel %vm367_vm6, %v368_v6, %v366_v52  ;;  %vm437_vm4 = vcmask 106496  }
  0xcd   :  { %v398_v24 = vsub.f32 1.5, %v397_v38  ;;  %v225_v3 = vsel %vm223_vm12, %v224_v61, %v222_v58  ;;  %v406_v2 = vsub.f32 %v189_v4, %v369_v45 }
  0xce   :  { %v477_v25 = vpop.eup %476 }
  0xcf   :  { %v479_v28 = vpop.eup %478  ;;  %v399_v11 = vmul.f32 %v475_v26, %v398_v24  ;;  %v383_v30 = vmul.f32 %v477_v25, %v743_v7  ;;  %v410_v17 = vand.u32 2147483647, %v406_v2 }
  0xd0   :  { %v371_v39 = vmul.f32 %v479_v28, %v746_v10 }
  0xd1   :  { %v400_v44 = vmul.f32 %v399_v11, %v729_v49  ;;  %v384_v47 = vmul.f32 %v477_v25, %v383_v30  ;;  %v415_v14 = vsel %vm414_vm3, %v410_v17, 0.0 }
  0xd2   :  { %v372_v37 = vmul.f32 %v479_v28, %v371_v39 }
  0xd3   :  { %v385_v50 = vmul.f32 0.5, %v384_v47  ;;  %v402_v42 = vsel %vm401_vm7, %v729_v49, %v400_v44  ;;  %v210_v49 = vsel %vm209_vm2, %v708_v19, %v208_v31  ;;  %vm416_vm2 = vcmask 111616  }
  0xd4   :  { %v373_v51 = vmul.f32 0.5, %v372_v37  ;;  %v405_v62 = vsel %vm403_vm11, %v404_v53, %v402_v42  ;;  %v213_v26 = vsel %vm211_vm8, %v212_v12, %v210_v49 }
  0xd5   :  { %v386_v55 = vsub.f32 1.5, %v385_v50  ;;  %v409_v56 = vsub.f32 %v225_v3, %v405_v62 }
  0xd6   :  { %v374_v59 = vsub.f32 1.5, %v373_v51 }
  0xd7   :  { %v387_v0 = vmul.f32 %v477_v25, %v386_v55  ;;  %v413_v13 = vand.u32 2147483647, %v409_v56 }
  0xd8   :  { %v375_v1 = vmul.f32 %v479_v28, %v374_v59 }
  0xd9   :  { %v388_v33 = vmul.f32 %v387_v0, %v743_v7  ;;  %v426_v38 = vsel %vm416_vm2, %v413_v13, 0.0 }
  0xda   :  { %v376_v29 = vmul.f32 %v375_v1, %v746_v10 }
  0xdb   :  { %v390_v57 = vsel %vm389_vm14, %v743_v7, %v388_v33 }
  0xdc   :  { %v378_v46 = vsel %vm377_vm15, %v746_v10, %v376_v29  ;;  %v393_v8 = vsel %vm391_vm0, %v392_v21, %v390_v57 }
  0xdd   :  { %v381_v15 = vsel %vm379_vm1, %v380_v5, %v378_v46  ;;  %v408_v54 = vsub.f32 %v213_v26, %v393_v8 }
  0xde   :  { %v407_v16 = vsub.f32 %v201_v9, %v381_v15 }
  0xdf   :  { %v412_v18 = vand.u32 2147483647, %v408_v54 }
  0xe0   :  { %v411_v7 = vand.u32 2147483647, %v407_v16 }
  0xe1   :  { %v425_v19 = vsel %vm414_vm3, %v412_v18, 0.0 }
  0xe2   :  { %v417_v22 = vsel %vm416_vm2, %v411_v7, 0.0  ;;  %v427_v10 = vadd.f32 %v426_v38, %v425_v19 }
  0xe3   :  { %v418_v23 = vadd.f32 %v417_v22, %v415_v14 }
  0xe4   :  { %v428_v24 = vrot.slane %v427_v10, 4 }
  0xe5   :  { %v419_v20 = vrot.slane %v418_v23, 4 }
  0xe6   :  { %v429_v25 = vadd.f32 %v428_v24, %v427_v10 }
  0xe7   :  { %v420_v27 = vadd.f32 %v419_v20, %v418_v23 }
  0xe8   :  { %v430_v12 = vrot.slane %v429_v25, 2 }
  0xe9   :  { %v421_v28 = vrot.slane %v420_v27, 2 }
  0xea   :  { %v431_v11 = vadd.f32 %v430_v12, %v429_v25 }
  0xeb   :  { %v422_v30 = vadd.f32 %v421_v28, %v420_v27 }
  0xec   :  { %v432_v34 = vrot.slane %v431_v11, 1 }
  0xed   :  { %v423_v35 = vrot.slane %v422_v30, 1 }
  0xee   :  { %v433_v39 = vadd.f32 %v432_v34, %v431_v11 }
  0xef   :  { %v424_v40 = vadd.f32 %v423_v35, %v422_v30 }
  0xf0   :  { %v435_v36 = vsel %vm414_vm3, %v433_v39, 0.0 }
  0xf1   :  { %v434_v41 = vsel %vm414_vm3, %v424_v40, 0.0 }
  0xf2   :  { %v436_v44 = vadd.f32 %v435_v36, %v434_v41 }
  0xf4   :  { %438 = vst.msk [vmem:[#allocation7] sm:$0x1] %vm437_vm4, %v436_v44 }
  0xf5   :  { %449 = dma.vmem_to_hbm [thread:$0]  %s445_s22, 16, %s447_s25, [#allocation4]  }
  0xf6   :  { %556 = dma.done.wait [#allocation4], 16  }
  0xf7   :  { %557 = vsyncadd [#allocation4], 4294967280 }
  0xf8   :  { %454 = vsyncpa [#allocation3], 1 }
  0xf9   :  { %455 = vsyncpa [#allocation6], 1 }
  0xfa   :  { %456 = vsyncpa [#allocation4], 1 }

</bundles_post_ra>
